<compile_context>
chip_gen: v7x
topology: tpu7x:2x2x1
jax: 0.10.0
libtpu: 0.0.40
codegen_flags: <defaults>
</compile_context>

<pallas_src>
import jax
import jax.numpy as jnp
from jax.experimental import pallas as pl
from jax.experimental.pallas import tpu as pltpu

HIDDEN = 16


def _dense_T(w, b, xT):
    """y^T = W @ x^T + b as an unrolled VPU broadcast-FMA chain.

    w:  (out, k)   PyTorch nn.Linear weight layout
    b:  (out, 1)
    xT: (k, TB)    -> returns (out, TB)
    K is tiny (2 or 16), so unrolling keeps the contraction off the MXU.
    """
    k = w.shape[1]
    acc = b  # (out, 1) broadcasts along the lane axis
    for i in range(k):
        acc = acc + w[:, i:i + 1] * xT[i:i + 1, :]
    return acc


def autoencoder_kernel(xT_ref,
                       w1_ref, b1_ref, w2_ref, b2_ref,
                       w3_ref, b3_ref, w4_ref, b4_ref,
                       xrecT_ref, zT_ref):
    xT = xT_ref[...]                                                 # (D, TB)

    # ---- encoder ----
    h1 = jnp.maximum(_dense_T(w1_ref[...], b1_ref[...], xT), 0.0)    # (16, TB)
    zT = _dense_T(w2_ref[...], b2_ref[...], h1)                      # (L, TB)

    # ---- decoder ----
    h2 = jnp.maximum(_dense_T(w3_ref[...], b3_ref[...], zT), 0.0)    # (16, TB)
    xrecT = _dense_T(w4_ref[...], b4_ref[...], h2)                   # (D, TB)

    zT_ref[...] = zT.astype(zT_ref.dtype)
    xrecT_ref[...] = xrecT.astype(xrecT_ref.dtype)


def _pick_batch_tile(B):
    # Largest lane-dense tile that divides the batch. Per-step VMEM footprint
    # is tiny at D=2; if input_dim ever grows, re-derive this against v7x's
    # 64 MiB VMEM (vs 128 MiB on v5e/v6e) or raise vmem_limit_bytes.
    for tb in (4096, 2048, 1024, 512, 256, 128):
        if B % tb == 0:
            return tb
    return B      # small / ragged batch: one block covering the full extent


def autoencoder_forward(x, params, tb=None):
    """x: (B, input_dim) f32. params: PyTorch-layout weights (out, in), biases (out, 1).

    Returns (x_recon, z) with shapes (B, input_dim), (B, latent_dim).
    """
    B, D = x.shape
    L = params["w2"].shape[0]

    if tb is None:
        tb = _pick_batch_tile(B)
    assert B % tb == 0, "batch tile must divide the batch"
    grid = (B // tb,)

    # Batch-on-lane layout: the kernel consumes/produces transposed slabs.
    xT = x.T                                                         # (D, B)

    batch_spec = lambda rows: pl.BlockSpec((rows, tb), lambda i: (0, i))
    const_spec = lambda a: pl.BlockSpec(a.shape, lambda i: (0, 0))   # VMEM-resident

    ws = (params["w1"], params["b1"], params["w2"], params["b2"],
          params["w3"], params["b3"], params["w4"], params["b4"])

    xrecT, zT = pl.pallas_call(
        autoencoder_kernel,
        grid=grid,
        in_specs=[batch_spec(D)] + [const_spec(a) for a in ws],
        out_specs=(batch_spec(D), batch_spec(L)),
        out_shape=(jax.ShapeDtypeStruct((D, B), jnp.float32),
                   jax.ShapeDtypeStruct((L, B), jnp.float32)),
        compiler_params=pltpu.CompilerParams(
            dimension_semantics=("parallel",)),   # shard grid across v7x's 2 TCs
    )(xT, *ws)

    return xrecT.T, zT.T


def init_params(key, input_dim, latent_dim, hidden=HIDDEN):
    """Deterministic synthetic init; weights kept in PyTorch (out, in) layout."""
    ks = jax.random.split(key, 8)

    def linear(kw, kb, fan_in, fan_out):
        # mimic torch.nn.Linear default init range: U(-1/sqrt(fan_in), 1/sqrt(fan_in))
        bound = 1.0 / jnp.sqrt(jnp.float32(fan_in))
        w = jax.random.uniform(kw, (fan_out, fan_in), jnp.float32, -bound, bound)
        b = jax.random.uniform(kb, (fan_out, 1), jnp.float32, -bound, bound)
        return w, b

    w1, b1 = linear(ks[0], ks[1], input_dim, hidden)
    w2, b2 = linear(ks[2], ks[3], hidden, latent_dim)
    w3, b3 = linear(ks[4], ks[5], latent_dim, hidden)
    w4, b4 = linear(ks[6], ks[7], hidden, input_dim)
    return {"w1": w1, "b1": b1, "w2": w2, "b2": b2,
            "w3": w3, "b3": b3, "w4": w4, "b4": b4}


def reference_forward(x, p):
    hp = jax.lax.Precision.HIGHEST
    dot = lambda a, b: jnp.dot(a, b, precision=hp)
    h1 = jnp.maximum(dot(x, p["w1"].T) + p["b1"][:, 0], 0.0)
    z = dot(h1, p["w2"].T) + p["b2"][:, 0]
    h2 = jnp.maximum(dot(z, p["w3"].T) + p["b3"][:, 0], 0.0)
    x_recon = dot(h2, p["w4"].T) + p["b4"][:, 0]
    return x_recon, z


if __name__ == "__main__":
    input_dim = 2     # the original script trains on 2-D point clouds
    latent_dim = 2
    # NOTE: at O(8)-row batches this should not be a Pallas kernel at all
    # (pure pallas_call overhead); the tiled/pipelined path only pays off
    # once the batch is in the thousands. 1024 rows keeps the demo tiny
    # while exercising the real multi-step grid.
    batch = 1024

    key = jax.random.PRNGKey(0)
    kx, kp = jax.random.split(key)
    x = jax.random.normal(kx, (batch, input_dim), jnp.float32)
    params = init_params(kp, input_dim, latent_dim)

    # tb=256 -> 4 pipelined grid steps for the demo; the production default
    # (tb=None) picks the largest divisor up to 4096 for best HBM utilization.
    x_recon, z = autoencoder_forward(x, params, tb=256)
    jax.block_until_ready((x_recon, z))

    # sanity check against plain-JAX reference
    xr_ref, z_ref = reference_forward(x, params)
    assert jnp.allclose(x_recon, xr_ref, atol=1e-5, rtol=1e-5)
    assert jnp.allclose(z, z_ref, atol=1e-5, rtol=1e-5)

    print("KERNEL_OK")
</pallas_src>

<mosaic_0001>
module attributes {stable_mosaic.version = 11 : i64} {
  func.func @autoencoder_kernel(%arg0: i32, %arg1: memref<2x256xf32, #tpu.memory_space<vmem>>, %arg2: memref<16x2xf32, #tpu.memory_space<vmem>>, %arg3: memref<16x1xf32, #tpu.memory_space<vmem>>, %arg4: memref<2x16xf32, #tpu.memory_space<vmem>>, %arg5: memref<2x1xf32, #tpu.memory_space<vmem>>, %arg6: memref<16x2xf32, #tpu.memory_space<vmem>>, %arg7: memref<16x1xf32, #tpu.memory_space<vmem>>, %arg8: memref<2x16xf32, #tpu.memory_space<vmem>>, %arg9: memref<2x1xf32, #tpu.memory_space<vmem>>, %arg10: memref<2x256xf32, #tpu.memory_space<vmem>>, %arg11: memref<2x256xf32, #tpu.memory_space<vmem>>) attributes {dimension_semantics = [#tpu.dimension_semantics<parallel>], iteration_bounds = array<i64: 4>, scalar_prefetch = 0 : i64, scratch_operands = 0 : i64, tpu.core_type = #tpu.core_type<tc>, window_params = [{transform_indices = @transform_0, window_bounds = array<i64: 2, 256>}, {pipeline_mode = #tpu.pipeline_mode<synchronous>, transform_indices = @transform_1, window_bounds = array<i64: 16, 2>}, {pipeline_mode = #tpu.pipeline_mode<synchronous>, transform_indices = @transform_2, window_bounds = array<i64: 16, 1>}, {pipeline_mode = #tpu.pipeline_mode<synchronous>, transform_indices = @transform_3, window_bounds = array<i64: 2, 16>}, {pipeline_mode = #tpu.pipeline_mode<synchronous>, transform_indices = @transform_4, window_bounds = array<i64: 2, 1>}, {pipeline_mode = #tpu.pipeline_mode<synchronous>, transform_indices = @transform_5, window_bounds = array<i64: 16, 2>}, {pipeline_mode = #tpu.pipeline_mode<synchronous>, transform_indices = @transform_6, window_bounds = array<i64: 16, 1>}, {pipeline_mode = #tpu.pipeline_mode<synchronous>, transform_indices = @transform_7, window_bounds = array<i64: 2, 16>}, {pipeline_mode = #tpu.pipeline_mode<synchronous>, transform_indices = @transform_8, window_bounds = array<i64: 2, 1>}, {transform_indices = @transform_9, window_bounds = array<i64: 2, 256>}, {transform_indices = @transform_10, window_bounds = array<i64: 2, 256>}]} {
    %c0 = arith.constant 0 : index
    %c0_0 = arith.constant 0 : index
    %0 = vector.load %arg1[%c0, %c0_0] : memref<2x256xf32, #tpu.memory_space<vmem>>, vector<2x256xf32>
    %c0_1 = arith.constant 0 : index
    %c0_2 = arith.constant 0 : index
    %1 = vector.load %arg2[%c0_1, %c0_2] : memref<16x2xf32, #tpu.memory_space<vmem>>, vector<16x2xf32>
    %c0_3 = arith.constant 0 : index
    %c0_4 = arith.constant 0 : index
    %2 = vector.load %arg3[%c0_3, %c0_4] : memref<16x1xf32, #tpu.memory_space<vmem>>, vector<16x1xf32>
    %3 = vector.extract_strided_slice %1 {offsets = [0, 0], sizes = [16, 1], strides = [1, 1]} : vector<16x2xf32> to vector<16x1xf32>
    %4 = vector.extract_strided_slice %0 {offsets = [0, 0], sizes = [1, 256], strides = [1, 1]} : vector<2x256xf32> to vector<1x256xf32>
    %5 = vector.broadcast %3 : vector<16x1xf32> to vector<16x256xf32>
    %6 = vector.broadcast %4 : vector<1x256xf32> to vector<16x256xf32>
    %7 = arith.mulf %5, %6 : vector<16x256xf32>
    %8 = vector.broadcast %2 : vector<16x1xf32> to vector<16x256xf32>
    %9 = arith.addf %8, %7 : vector<16x256xf32>
    %10 = vector.extract_strided_slice %1 {offsets = [0, 1], sizes = [16, 1], strides = [1, 1]} : vector<16x2xf32> to vector<16x1xf32>
    %11 = vector.extract_strided_slice %0 {offsets = [1, 0], sizes = [1, 256], strides = [1, 1]} : vector<2x256xf32> to vector<1x256xf32>
    %12 = vector.broadcast %10 : vector<16x1xf32> to vector<16x256xf32>
    %13 = vector.broadcast %11 : vector<1x256xf32> to vector<16x256xf32>
    %14 = arith.mulf %12, %13 : vector<16x256xf32>
    %15 = arith.addf %9, %14 : vector<16x256xf32>
    %cst = arith.constant 0.000000e+00 : f32
    %16 = vector.broadcast %cst : f32 to vector<16x256xf32>
    %17 = arith.maximumf %15, %16 : vector<16x256xf32>
    %c0_5 = arith.constant 0 : index
    %c0_6 = arith.constant 0 : index
    %18 = vector.load %arg4[%c0_5, %c0_6] : memref<2x16xf32, #tpu.memory_space<vmem>>, vector<2x16xf32>
    %c0_7 = arith.constant 0 : index
    %c0_8 = arith.constant 0 : index
    %19 = vector.load %arg5[%c0_7, %c0_8] : memref<2x1xf32, #tpu.memory_space<vmem>>, vector<2x1xf32>
    %20 = vector.extract_strided_slice %18 {offsets = [0, 0], sizes = [2, 1], strides = [1, 1]} : vector<2x16xf32> to vector<2x1xf32>
    %21 = vector.extract_strided_slice %17 {offsets = [0, 0], sizes = [1, 256], strides = [1, 1]} : vector<16x256xf32> to vector<1x256xf32>
    %22 = vector.broadcast %20 : vector<2x1xf32> to vector<2x256xf32>
    %23 = vector.broadcast %21 : vector<1x256xf32> to vector<2x256xf32>
    %24 = arith.mulf %22, %23 : vector<2x256xf32>
    %25 = vector.broadcast %19 : vector<2x1xf32> to vector<2x256xf32>
    %26 = arith.addf %25, %24 : vector<2x256xf32>
    %27 = vector.extract_strided_slice %18 {offsets = [0, 1], sizes = [2, 1], strides = [1, 1]} : vector<2x16xf32> to vector<2x1xf32>
    %28 = vector.extract_strided_slice %17 {offsets = [1, 0], sizes = [1, 256], strides = [1, 1]} : vector<16x256xf32> to vector<1x256xf32>
    %29 = vector.broadcast %27 : vector<2x1xf32> to vector<2x256xf32>
    %30 = vector.broadcast %28 : vector<1x256xf32> to vector<2x256xf32>
    %31 = arith.mulf %29, %30 : vector<2x256xf32>
    %32 = arith.addf %26, %31 : vector<2x256xf32>
    %33 = vector.extract_strided_slice %18 {offsets = [0, 2], sizes = [2, 1], strides = [1, 1]} : vector<2x16xf32> to vector<2x1xf32>
    %34 = vector.extract_strided_slice %17 {offsets = [2, 0], sizes = [1, 256], strides = [1, 1]} : vector<16x256xf32> to vector<1x256xf32>
    %35 = vector.broadcast %33 : vector<2x1xf32> to vector<2x256xf32>
    %36 = vector.broadcast %34 : vector<1x256xf32> to vector<2x256xf32>
    %37 = arith.mulf %35, %36 : vector<2x256xf32>
    %38 = arith.addf %32, %37 : vector<2x256xf32>
    %39 = vector.extract_strided_slice %18 {offsets = [0, 3], sizes = [2, 1], strides = [1, 1]} : vector<2x16xf32> to vector<2x1xf32>
    %40 = vector.extract_strided_slice %17 {offsets = [3, 0], sizes = [1, 256], strides = [1, 1]} : vector<16x256xf32> to vector<1x256xf32>
    %41 = vector.broadcast %39 : vector<2x1xf32> to vector<2x256xf32>
    %42 = vector.broadcast %40 : vector<1x256xf32> to vector<2x256xf32>
    %43 = arith.mulf %41, %42 : vector<2x256xf32>
    %44 = arith.addf %38, %43 : vector<2x256xf32>
    %45 = vector.extract_strided_slice %18 {offsets = [0, 4], sizes = [2, 1], strides = [1, 1]} : vector<2x16xf32> to vector<2x1xf32>
    %46 = vector.extract_strided_slice %17 {offsets = [4, 0], sizes = [1, 256], strides = [1, 1]} : vector<16x256xf32> to vector<1x256xf32>
    %47 = vector.broadcast %45 : vector<2x1xf32> to vector<2x256xf32>
    %48 = vector.broadcast %46 : vector<1x256xf32> to vector<2x256xf32>
    %49 = arith.mulf %47, %48 : vector<2x256xf32>
    %50 = arith.addf %44, %49 : vector<2x256xf32>
    %51 = vector.extract_strided_slice %18 {offsets = [0, 5], sizes = [2, 1], strides = [1, 1]} : vector<2x16xf32> to vector<2x1xf32>
    %52 = vector.extract_strided_slice %17 {offsets = [5, 0], sizes = [1, 256], strides = [1, 1]} : vector<16x256xf32> to vector<1x256xf32>
    %53 = vector.broadcast %51 : vector<2x1xf32> to vector<2x256xf32>
    %54 = vector.broadcast %52 : vector<1x256xf32> to vector<2x256xf32>
    %55 = arith.mulf %53, %54 : vector<2x256xf32>
    %56 = arith.addf %50, %55 : vector<2x256xf32>
    %57 = vector.extract_strided_slice %18 {offsets = [0, 6], sizes = [2, 1], strides = [1, 1]} : vector<2x16xf32> to vector<2x1xf32>
    %58 = vector.extract_strided_slice %17 {offsets = [6, 0], sizes = [1, 256], strides = [1, 1]} : vector<16x256xf32> to vector<1x256xf32>
    %59 = vector.broadcast %57 : vector<2x1xf32> to vector<2x256xf32>
    %60 = vector.broadcast %58 : vector<1x256xf32> to vector<2x256xf32>
    %61 = arith.mulf %59, %60 : vector<2x256xf32>
    %62 = arith.addf %56, %61 : vector<2x256xf32>
    %63 = vector.extract_strided_slice %18 {offsets = [0, 7], sizes = [2, 1], strides = [1, 1]} : vector<2x16xf32> to vector<2x1xf32>
    %64 = vector.extract_strided_slice %17 {offsets = [7, 0], sizes = [1, 256], strides = [1, 1]} : vector<16x256xf32> to vector<1x256xf32>
    %65 = vector.broadcast %63 : vector<2x1xf32> to vector<2x256xf32>
    %66 = vector.broadcast %64 : vector<1x256xf32> to vector<2x256xf32>
    %67 = arith.mulf %65, %66 : vector<2x256xf32>
    %68 = arith.addf %62, %67 : vector<2x256xf32>
    %69 = vector.extract_strided_slice %18 {offsets = [0, 8], sizes = [2, 1], strides = [1, 1]} : vector<2x16xf32> to vector<2x1xf32>
    %70 = vector.extract_strided_slice %17 {offsets = [8, 0], sizes = [1, 256], strides = [1, 1]} : vector<16x256xf32> to vector<1x256xf32>
    %71 = vector.broadcast %69 : vector<2x1xf32> to vector<2x256xf32>
    %72 = vector.broadcast %70 : vector<1x256xf32> to vector<2x256xf32>
    %73 = arith.mulf %71, %72 : vector<2x256xf32>
    %74 = arith.addf %68, %73 : vector<2x256xf32>
    %75 = vector.extract_strided_slice %18 {offsets = [0, 9], sizes = [2, 1], strides = [1, 1]} : vector<2x16xf32> to vector<2x1xf32>
    %76 = vector.extract_strided_slice %17 {offsets = [9, 0], sizes = [1, 256], strides = [1, 1]} : vector<16x256xf32> to vector<1x256xf32>
    %77 = vector.broadcast %75 : vector<2x1xf32> to vector<2x256xf32>
    %78 = vector.broadcast %76 : vector<1x256xf32> to vector<2x256xf32>
    %79 = arith.mulf %77, %78 : vector<2x256xf32>
    %80 = arith.addf %74, %79 : vector<2x256xf32>
    %81 = vector.extract_strided_slice %18 {offsets = [0, 10], sizes = [2, 1], strides = [1, 1]} : vector<2x16xf32> to vector<2x1xf32>
    %82 = vector.extract_strided_slice %17 {offsets = [10, 0], sizes = [1, 256], strides = [1, 1]} : vector<16x256xf32> to vector<1x256xf32>
    %83 = vector.broadcast %81 : vector<2x1xf32> to vector<2x256xf32>
    %84 = vector.broadcast %82 : vector<1x256xf32> to vector<2x256xf32>
    %85 = arith.mulf %83, %84 : vector<2x256xf32>
    %86 = arith.addf %80, %85 : vector<2x256xf32>
    %87 = vector.extract_strided_slice %18 {offsets = [0, 11], sizes = [2, 1], strides = [1, 1]} : vector<2x16xf32> to vector<2x1xf32>
    %88 = vector.extract_strided_slice %17 {offsets = [11, 0], sizes = [1, 256], strides = [1, 1]} : vector<16x256xf32> to vector<1x256xf32>
    %89 = vector.broadcast %87 : vector<2x1xf32> to vector<2x256xf32>
    %90 = vector.broadcast %88 : vector<1x256xf32> to vector<2x256xf32>
    %91 = arith.mulf %89, %90 : vector<2x256xf32>
    %92 = arith.addf %86, %91 : vector<2x256xf32>
    %93 = vector.extract_strided_slice %18 {offsets = [0, 12], sizes = [2, 1], strides = [1, 1]} : vector<2x16xf32> to vector<2x1xf32>
    %94 = vector.extract_strided_slice %17 {offsets = [12, 0], sizes = [1, 256], strides = [1, 1]} : vector<16x256xf32> to vector<1x256xf32>
    %95 = vector.broadcast %93 : vector<2x1xf32> to vector<2x256xf32>
    %96 = vector.broadcast %94 : vector<1x256xf32> to vector<2x256xf32>
    %97 = arith.mulf %95, %96 : vector<2x256xf32>
    %98 = arith.addf %92, %97 : vector<2x256xf32>
    %99 = vector.extract_strided_slice %18 {offsets = [0, 13], sizes = [2, 1], strides = [1, 1]} : vector<2x16xf32> to vector<2x1xf32>
    %100 = vector.extract_strided_slice %17 {offsets = [13, 0], sizes = [1, 256], strides = [1, 1]} : vector<16x256xf32> to vector<1x256xf32>
    %101 = vector.broadcast %99 : vector<2x1xf32> to vector<2x256xf32>
    %102 = vector.broadcast %100 : vector<1x256xf32> to vector<2x256xf32>
    %103 = arith.mulf %101, %102 : vector<2x256xf32>
    %104 = arith.addf %98, %103 : vector<2x256xf32>
    %105 = vector.extract_strided_slice %18 {offsets = [0, 14], sizes = [2, 1], strides = [1, 1]} : vector<2x16xf32> to vector<2x1xf32>
    %106 = vector.extract_strided_slice %17 {offsets = [14, 0], sizes = [1, 256], strides = [1, 1]} : vector<16x256xf32> to vector<1x256xf32>
    %107 = vector.broadcast %105 : vector<2x1xf32> to vector<2x256xf32>
    %108 = vector.broadcast %106 : vector<1x256xf32> to vector<2x256xf32>
    %109 = arith.mulf %107, %108 : vector<2x256xf32>
    %110 = arith.addf %104, %109 : vector<2x256xf32>
    %111 = vector.extract_strided_slice %18 {offsets = [0, 15], sizes = [2, 1], strides = [1, 1]} : vector<2x16xf32> to vector<2x1xf32>
    %112 = vector.extract_strided_slice %17 {offsets = [15, 0], sizes = [1, 256], strides = [1, 1]} : vector<16x256xf32> to vector<1x256xf32>
    %113 = vector.broadcast %111 : vector<2x1xf32> to vector<2x256xf32>
    %114 = vector.broadcast %112 : vector<1x256xf32> to vector<2x256xf32>
    %115 = arith.mulf %113, %114 : vector<2x256xf32>
    %116 = arith.addf %110, %115 : vector<2x256xf32>
    %c0_9 = arith.constant 0 : index
    %c0_10 = arith.constant 0 : index
    %117 = vector.load %arg6[%c0_9, %c0_10] : memref<16x2xf32, #tpu.memory_space<vmem>>, vector<16x2xf32>
    %c0_11 = arith.constant 0 : index
    %c0_12 = arith.constant 0 : index
    %118 = vector.load %arg7[%c0_11, %c0_12] : memref<16x1xf32, #tpu.memory_space<vmem>>, vector<16x1xf32>
    %119 = vector.extract_strided_slice %117 {offsets = [0, 0], sizes = [16, 1], strides = [1, 1]} : vector<16x2xf32> to vector<16x1xf32>
    %120 = vector.extract_strided_slice %116 {offsets = [0, 0], sizes = [1, 256], strides = [1, 1]} : vector<2x256xf32> to vector<1x256xf32>
    %121 = vector.broadcast %119 : vector<16x1xf32> to vector<16x256xf32>
    %122 = vector.broadcast %120 : vector<1x256xf32> to vector<16x256xf32>
    %123 = arith.mulf %121, %122 : vector<16x256xf32>
    %124 = vector.broadcast %118 : vector<16x1xf32> to vector<16x256xf32>
    %125 = arith.addf %124, %123 : vector<16x256xf32>
    %126 = vector.extract_strided_slice %117 {offsets = [0, 1], sizes = [16, 1], strides = [1, 1]} : vector<16x2xf32> to vector<16x1xf32>
    %127 = vector.extract_strided_slice %116 {offsets = [1, 0], sizes = [1, 256], strides = [1, 1]} : vector<2x256xf32> to vector<1x256xf32>
    %128 = vector.broadcast %126 : vector<16x1xf32> to vector<16x256xf32>
    %129 = vector.broadcast %127 : vector<1x256xf32> to vector<16x256xf32>
    %130 = arith.mulf %128, %129 : vector<16x256xf32>
    %131 = arith.addf %125, %130 : vector<16x256xf32>
    %cst_13 = arith.constant 0.000000e+00 : f32
    %132 = vector.broadcast %cst_13 : f32 to vector<16x256xf32>
    %133 = arith.maximumf %131, %132 : vector<16x256xf32>
    %c0_14 = arith.constant 0 : index
    %c0_15 = arith.constant 0 : index
    %134 = vector.load %arg8[%c0_14, %c0_15] : memref<2x16xf32, #tpu.memory_space<vmem>>, vector<2x16xf32>
    %c0_16 = arith.constant 0 : index
    %c0_17 = arith.constant 0 : index
    %135 = vector.load %arg9[%c0_16, %c0_17] : memref<2x1xf32, #tpu.memory_space<vmem>>, vector<2x1xf32>
    %136 = vector.extract_strided_slice %134 {offsets = [0, 0], sizes = [2, 1], strides = [1, 1]} : vector<2x16xf32> to vector<2x1xf32>
    %137 = vector.extract_strided_slice %133 {offsets = [0, 0], sizes = [1, 256], strides = [1, 1]} : vector<16x256xf32> to vector<1x256xf32>
    %138 = vector.broadcast %136 : vector<2x1xf32> to vector<2x256xf32>
    %139 = vector.broadcast %137 : vector<1x256xf32> to vector<2x256xf32>
    %140 = arith.mulf %138, %139 : vector<2x256xf32>
    %141 = vector.broadcast %135 : vector<2x1xf32> to vector<2x256xf32>
    %142 = arith.addf %141, %140 : vector<2x256xf32>
    %143 = vector.extract_strided_slice %134 {offsets = [0, 1], sizes = [2, 1], strides = [1, 1]} : vector<2x16xf32> to vector<2x1xf32>
    %144 = vector.extract_strided_slice %133 {offsets = [1, 0], sizes = [1, 256], strides = [1, 1]} : vector<16x256xf32> to vector<1x256xf32>
    %145 = vector.broadcast %143 : vector<2x1xf32> to vector<2x256xf32>
    %146 = vector.broadcast %144 : vector<1x256xf32> to vector<2x256xf32>
    %147 = arith.mulf %145, %146 : vector<2x256xf32>
    %148 = arith.addf %142, %147 : vector<2x256xf32>
    %149 = vector.extract_strided_slice %134 {offsets = [0, 2], sizes = [2, 1], strides = [1, 1]} : vector<2x16xf32> to vector<2x1xf32>
    %150 = vector.extract_strided_slice %133 {offsets = [2, 0], sizes = [1, 256], strides = [1, 1]} : vector<16x256xf32> to vector<1x256xf32>
    %151 = vector.broadcast %149 : vector<2x1xf32> to vector<2x256xf32>
    %152 = vector.broadcast %150 : vector<1x256xf32> to vector<2x256xf32>
    %153 = arith.mulf %151, %152 : vector<2x256xf32>
    %154 = arith.addf %148, %153 : vector<2x256xf32>
    %155 = vector.extract_strided_slice %134 {offsets = [0, 3], sizes = [2, 1], strides = [1, 1]} : vector<2x16xf32> to vector<2x1xf32>
    %156 = vector.extract_strided_slice %133 {offsets = [3, 0], sizes = [1, 256], strides = [1, 1]} : vector<16x256xf32> to vector<1x256xf32>
    %157 = vector.broadcast %155 : vector<2x1xf32> to vector<2x256xf32>
    %158 = vector.broadcast %156 : vector<1x256xf32> to vector<2x256xf32>
    %159 = arith.mulf %157, %158 : vector<2x256xf32>
    %160 = arith.addf %154, %159 : vector<2x256xf32>
    %161 = vector.extract_strided_slice %134 {offsets = [0, 4], sizes = [2, 1], strides = [1, 1]} : vector<2x16xf32> to vector<2x1xf32>
    %162 = vector.extract_strided_slice %133 {offsets = [4, 0], sizes = [1, 256], strides = [1, 1]} : vector<16x256xf32> to vector<1x256xf32>
    %163 = vector.broadcast %161 : vector<2x1xf32> to vector<2x256xf32>
    %164 = vector.broadcast %162 : vector<1x256xf32> to vector<2x256xf32>
    %165 = arith.mulf %163, %164 : vector<2x256xf32>
    %166 = arith.addf %160, %165 : vector<2x256xf32>
    %167 = vector.extract_strided_slice %134 {offsets = [0, 5], sizes = [2, 1], strides = [1, 1]} : vector<2x16xf32> to vector<2x1xf32>
    %168 = vector.extract_strided_slice %133 {offsets = [5, 0], sizes = [1, 256], strides = [1, 1]} : vector<16x256xf32> to vector<1x256xf32>
    %169 = vector.broadcast %167 : vector<2x1xf32> to vector<2x256xf32>
    %170 = vector.broadcast %168 : vector<1x256xf32> to vector<2x256xf32>
    %171 = arith.mulf %169, %170 : vector<2x256xf32>
    %172 = arith.addf %166, %171 : vector<2x256xf32>
    %173 = vector.extract_strided_slice %134 {offsets = [0, 6], sizes = [2, 1], strides = [1, 1]} : vector<2x16xf32> to vector<2x1xf32>
    %174 = vector.extract_strided_slice %133 {offsets = [6, 0], sizes = [1, 256], strides = [1, 1]} : vector<16x256xf32> to vector<1x256xf32>
    %175 = vector.broadcast %173 : vector<2x1xf32> to vector<2x256xf32>
    %176 = vector.broadcast %174 : vector<1x256xf32> to vector<2x256xf32>
    %177 = arith.mulf %175, %176 : vector<2x256xf32>
    %178 = arith.addf %172, %177 : vector<2x256xf32>
    %179 = vector.extract_strided_slice %134 {offsets = [0, 7], sizes = [2, 1], strides = [1, 1]} : vector<2x16xf32> to vector<2x1xf32>
    %180 = vector.extract_strided_slice %133 {offsets = [7, 0], sizes = [1, 256], strides = [1, 1]} : vector<16x256xf32> to vector<1x256xf32>
    %181 = vector.broadcast %179 : vector<2x1xf32> to vector<2x256xf32>
    %182 = vector.broadcast %180 : vector<1x256xf32> to vector<2x256xf32>
    %183 = arith.mulf %181, %182 : vector<2x256xf32>
    %184 = arith.addf %178, %183 : vector<2x256xf32>
    %185 = vector.extract_strided_slice %134 {offsets = [0, 8], sizes = [2, 1], strides = [1, 1]} : vector<2x16xf32> to vector<2x1xf32>
    %186 = vector.extract_strided_slice %133 {offsets = [8, 0], sizes = [1, 256], strides = [1, 1]} : vector<16x256xf32> to vector<1x256xf32>
    %187 = vector.broadcast %185 : vector<2x1xf32> to vector<2x256xf32>
    %188 = vector.broadcast %186 : vector<1x256xf32> to vector<2x256xf32>
    %189 = arith.mulf %187, %188 : vector<2x256xf32>
    %190 = arith.addf %184, %189 : vector<2x256xf32>
    %191 = vector.extract_strided_slice %134 {offsets = [0, 9], sizes = [2, 1], strides = [1, 1]} : vector<2x16xf32> to vector<2x1xf32>
    %192 = vector.extract_strided_slice %133 {offsets = [9, 0], sizes = [1, 256], strides = [1, 1]} : vector<16x256xf32> to vector<1x256xf32>
    %193 = vector.broadcast %191 : vector<2x1xf32> to vector<2x256xf32>
    %194 = vector.broadcast %192 : vector<1x256xf32> to vector<2x256xf32>
    %195 = arith.mulf %193, %194 : vector<2x256xf32>
    %196 = arith.addf %190, %195 : vector<2x256xf32>
    %197 = vector.extract_strided_slice %134 {offsets = [0, 10], sizes = [2, 1], strides = [1, 1]} : vector<2x16xf32> to vector<2x1xf32>
    %198 = vector.extract_strided_slice %133 {offsets = [10, 0], sizes = [1, 256], strides = [1, 1]} : vector<16x256xf32> to vector<1x256xf32>
    %199 = vector.broadcast %197 : vector<2x1xf32> to vector<2x256xf32>
    %200 = vector.broadcast %198 : vector<1x256xf32> to vector<2x256xf32>
    %201 = arith.mulf %199, %200 : vector<2x256xf32>
    %202 = arith.addf %196, %201 : vector<2x256xf32>
    %203 = vector.extract_strided_slice %134 {offsets = [0, 11], sizes = [2, 1], strides = [1, 1]} : vector<2x16xf32> to vector<2x1xf32>
    %204 = vector.extract_strided_slice %133 {offsets = [11, 0], sizes = [1, 256], strides = [1, 1]} : vector<16x256xf32> to vector<1x256xf32>
    %205 = vector.broadcast %203 : vector<2x1xf32> to vector<2x256xf32>
    %206 = vector.broadcast %204 : vector<1x256xf32> to vector<2x256xf32>
    %207 = arith.mulf %205, %206 : vector<2x256xf32>
    %208 = arith.addf %202, %207 : vector<2x256xf32>
    %209 = vector.extract_strided_slice %134 {offsets = [0, 12], sizes = [2, 1], strides = [1, 1]} : vector<2x16xf32> to vector<2x1xf32>
    %210 = vector.extract_strided_slice %133 {offsets = [12, 0], sizes = [1, 256], strides = [1, 1]} : vector<16x256xf32> to vector<1x256xf32>
    %211 = vector.broadcast %209 : vector<2x1xf32> to vector<2x256xf32>
    %212 = vector.broadcast %210 : vector<1x256xf32> to vector<2x256xf32>
    %213 = arith.mulf %211, %212 : vector<2x256xf32>
    %214 = arith.addf %208, %213 : vector<2x256xf32>
    %215 = vector.extract_strided_slice %134 {offsets = [0, 13], sizes = [2, 1], strides = [1, 1]} : vector<2x16xf32> to vector<2x1xf32>
    %216 = vector.extract_strided_slice %133 {offsets = [13, 0], sizes = [1, 256], strides = [1, 1]} : vector<16x256xf32> to vector<1x256xf32>
    %217 = vector.broadcast %215 : vector<2x1xf32> to vector<2x256xf32>
    %218 = vector.broadcast %216 : vector<1x256xf32> to vector<2x256xf32>
    %219 = arith.mulf %217, %218 : vector<2x256xf32>
    %220 = arith.addf %214, %219 : vector<2x256xf32>
    %221 = vector.extract_strided_slice %134 {offsets = [0, 14], sizes = [2, 1], strides = [1, 1]} : vector<2x16xf32> to vector<2x1xf32>
    %222 = vector.extract_strided_slice %133 {offsets = [14, 0], sizes = [1, 256], strides = [1, 1]} : vector<16x256xf32> to vector<1x256xf32>
    %223 = vector.broadcast %221 : vector<2x1xf32> to vector<2x256xf32>
    %224 = vector.broadcast %222 : vector<1x256xf32> to vector<2x256xf32>
    %225 = arith.mulf %223, %224 : vector<2x256xf32>
    %226 = arith.addf %220, %225 : vector<2x256xf32>
    %227 = vector.extract_strided_slice %134 {offsets = [0, 15], sizes = [2, 1], strides = [1, 1]} : vector<2x16xf32> to vector<2x1xf32>
    %228 = vector.extract_strided_slice %133 {offsets = [15, 0], sizes = [1, 256], strides = [1, 1]} : vector<16x256xf32> to vector<1x256xf32>
    %229 = vector.broadcast %227 : vector<2x1xf32> to vector<2x256xf32>
    %230 = vector.broadcast %228 : vector<1x256xf32> to vector<2x256xf32>
    %231 = arith.mulf %229, %230 : vector<2x256xf32>
    %232 = arith.addf %226, %231 : vector<2x256xf32>
    %c0_18 = arith.constant 0 : index
    %c0_19 = arith.constant 0 : index
    %233 = vector.load %arg11[%c0_18, %c0_19] : memref<2x256xf32, #tpu.memory_space<vmem>>, vector<2x256xf32>
    tpu.vector_store %arg11[%c0_18, %c0_19], %116 {strides = array<i32>} : memref<2x256xf32, #tpu.memory_space<vmem>>, vector<2x256xf32>,
    %c0_20 = arith.constant 0 : index
    %c0_21 = arith.constant 0 : index
    %234 = vector.load %arg10[%c0_20, %c0_21] : memref<2x256xf32, #tpu.memory_space<vmem>>, vector<2x256xf32>
    tpu.vector_store %arg10[%c0_20, %c0_21], %232 {strides = array<i32>} : memref<2x256xf32, #tpu.memory_space<vmem>>, vector<2x256xf32>,
    return
  }
  func.func @transform_0(%arg0: i32) -> (i32, i32) {
    %c0_i32 = arith.constant 0 : i32
    %c0_i32_0 = arith.constant 0 : i32
    return %c0_i32, %arg0 : i32, i32
  }
  func.func @transform_1(%arg0: i32) -> (i32, i32) {
    %c0_i32 = arith.constant 0 : i32
    %c0_i32_0 = arith.constant 0 : i32
    %c0_i32_1 = arith.constant 0 : i32
    return %c0_i32, %c0_i32_0 : i32, i32
  }
  func.func @transform_2(%arg0: i32) -> (i32, i32) {
    %c0_i32 = arith.constant 0 : i32
    %c0_i32_0 = arith.constant 0 : i32
    %c0_i32_1 = arith.constant 0 : i32
    return %c0_i32, %c0_i32_0 : i32, i32
  }
  func.func @transform_3(%arg0: i32) -> (i32, i32) {
    %c0_i32 = arith.constant 0 : i32
    %c0_i32_0 = arith.constant 0 : i32
    %c0_i32_1 = arith.constant 0 : i32
    return %c0_i32, %c0_i32_0 : i32, i32
  }
  func.func @transform_4(%arg0: i32) -> (i32, i32) {
    %c0_i32 = arith.constant 0 : i32
    %c0_i32_0 = arith.constant 0 : i32
    %c0_i32_1 = arith.constant 0 : i32
    return %c0_i32, %c0_i32_0 : i32, i32
  }
  func.func @transform_5(%arg0: i32) -> (i32, i32) {
    %c0_i32 = arith.constant 0 : i32
    %c0_i32_0 = arith.constant 0 : i32
    %c0_i32_1 = arith.constant 0 : i32
    return %c0_i32, %c0_i32_0 : i32, i32
  }
  func.func @transform_6(%arg0: i32) -> (i32, i32) {
    %c0_i32 = arith.constant 0 : i32
    %c0_i32_0 = arith.constant 0 : i32
    %c0_i32_1 = arith.constant 0 : i32
    return %c0_i32, %c0_i32_0 : i32, i32
  }
  func.func @transform_7(%arg0: i32) -> (i32, i32) {
    %c0_i32 = arith.constant 0 : i32
    %c0_i32_0 = arith.constant 0 : i32
    %c0_i32_1 = arith.constant 0 : i32
    return %c0_i32, %c0_i32_0 : i32, i32
  }
  func.func @transform_8(%arg0: i32) -> (i32, i32) {
    %c0_i32 = arith.constant 0 : i32
    %c0_i32_0 = arith.constant 0 : i32
    %c0_i32_1 = arith.constant 0 : i32
    return %c0_i32, %c0_i32_0 : i32, i32
  }
  func.func @transform_9(%arg0: i32) -> (i32, i32) {
    %c0_i32 = arith.constant 0 : i32
    %c0_i32_0 = arith.constant 0 : i32
    return %c0_i32, %arg0 : i32, i32
  }
  func.func @transform_10(%arg0: i32) -> (i32, i32) {
    %c0_i32 = arith.constant 0 : i32
    %c0_i32_0 = arith.constant 0 : i32
    return %c0_i32, %arg0 : i32, i32
  }
}

</mosaic_0001>

<bundles_post_ra>
// kernel: tpu_custom_call.1
= control target key start
LH: loop header
LB: loop body
LE: loop exit
PB: predicated region body
PF: predicated region fallthrough
CT: control target
= control target key end

     0   :  { %s1881_s0 = inlined_call_operand.vmem [shape: f32[2,1024], index: 0, kind: input, shape index: {}]   ;;  %s1882_s1 = inlined_call_operand.vmem [shape: f32[16,2], index: 1, kind: input, shape index: {}]   ;;  %s1883_s2 = inlined_call_operand.vmem [shape: f32[16,1], index: 2, kind: input, shape index: {}]   ;;  %s1884_s3 = inlined_call_operand.vmem [shape: f32[2,16], index: 3, kind: input, shape index: {}]   ;;  %s1885_s4 = inlined_call_operand.vmem [shape: f32[2,1], index: 4, kind: input, shape index: {}]   ;;  %s1886_s5 = inlined_call_operand.vmem [shape: f32[16,2], index: 5, kind: input, shape index: {}]   ;;  %s1887_s6 = inlined_call_operand.vmem [shape: f32[16,1], index: 6, kind: input, shape index: {}]   ;;  %s1888_s7 = inlined_call_operand.vmem [shape: f32[2,16], index: 7, kind: input, shape index: {}]   ;;  %s1889_s8 = inlined_call_operand.vmem [shape: f32[2,1], index: 8, kind: input, shape index: {}]   ;;  %s1890_s9 = inlined_call_operand.hbm [shape: f32[2,1024], index: 9, kind: output, shape index: {0}]   ;;  %s1891_s10 = inlined_call_operand.hbm [shape: f32[2,1024], index: 10, kind: output, shape index: {1}]  }
   0x1   :  { %1894 = sst [smem:[#allocation8_spill]] %s1881_s0 }
   0x2   :  { %16 = vsyncpa [#allocation3], 0 }
   0x3   :  { %18 = vsyncpa [#allocation3 + $0x1], 0 }
   0x4   :  { %19 = vsyncpa [#allocation5], 0 }
   0x5   :  { %21 = vsyncpa [#allocation5 + $0x1], 0  ;;  %s1495_s13 = smov 0   ;;  %s1497_s14 = smov 0  }
   0x6   :  { %s1499_s15 = smov 0   ;;  %s1501_s16 = smov 0  }
   0x7 LB: > { %s1516_s17 = sadd.s32 4294967295, %s1420_s16   ;;  %s1208_s18 = sadd.s32 4294967294, %s1420_s16   ;;  %s1420_s16 = sphi %s1501_s16, %s1903_s16   ;;  %s1416_s15 = sphi %s1499_s15, %s1902_s15   ;;  %s1412_s14 = sphi %s1497_s14, %s1901_s14   ;;  %s1408_s13 = sphi %s1495_s13, %s1900_s13  }
   0x8   : > { %s1520_s19 = sadd.s32 1, %s1420_s16   ;;  %s228_s20 = sadd.s32 1, %s1416_s15 }
   0x9   : > { %s225_s21 = ssub.s32 %s1420_s16, %s1520_s19  ;;  %p238_p0 = scmp.ne.s32.totalorder %s1416_s15, %s1412_s14 }
   0xa   : > { %p226_p1 = scmp.eq.s32.totalorder %s225_s21, 0  ;;  %p239_p2 = scmp.eq.s32.totalorder %s1516_s17, 3 }
   0xb   : > { %p244_p3 = scmp.ne.s32.totalorder %s1412_s14, %s1408_s13  ;;  %p245_p4 = scmp.eq.s32.totalorder %s1208_s18, 3 }
   0xc   : > { %s1531_s22 = scalar_select %p226_p1, %s1416_s15, %s228_s20  }
   0xd   : > { %p1533_p5 = por %p239_p2, %p238_p0  ;;  %p1537_p6 = por %p245_p4, %p244_p3 }
   0xe   : > { %p1211_p7 = scmp.ge.s32.totalorder %s1420_s16, 1  ;;  %p322_p8 = scmp.lt.s32.totalorder %s1420_s16, 5 }
  0x10   : > { %p323_p9 = pnand %p1211_p7, %p322_p8 }
  0x11   : > { %v376_v0 = vld [vmem:[%s1883_s2] sm:$0xff] (!%p323_p9)  ;;  %v1422_v2 = vmov (!%p323_p9), 1   ;;  %v1423_v3 = vmov (!%p323_p9), 0   ;;  %v377_v4 = vld [vmem:[%s1883_s2 + $0x8] sm:$0xff] (!%p323_p9)  ;;  %v1424_v8 = vmov (!%p323_p9), 3   ;;  %v1425_v9 = vmov (!%p323_p9), 6  }
  0x12   : > { %326 = sbr.rel (%p323_p9) target bundleno = 305 (0x131), region = 56  ;;  %v374_v1 = vld [vmem:[%s1882_s1] sm:$0xff] (!%p323_p9)  ;;  %1289 = vset.pattern.permute.xlu0 (!%p323_p9), %v1422_v2  ;;  %1288 = vset.pattern.permute.xlu1 (!%p323_p9), %v1423_v3  ;;  %v375_v5 = vld [vmem:[%s1882_s1 + $0x8] sm:$0xff] (!%p323_p9)  ;;  %v1426_v10 = vmov (!%p323_p9), 2   ;;  %v1427_v11 = vmov (!%p323_p9), 9   ;;  %v1428_v12 = vmov (!%p323_p9), 4   ;;  %v389_v28 = vlaneseq (!%p323_p9) }
  0x13   : > { %413 = vperm.xlu1 (!%p323_p9), %1288, %v376_v0   ;;  %426 = vperm.xlu0 (!%p323_p9), %1289, %v374_v1   ;;  %v464_v6 = vld [vmem:[%s1885_s4] sm:$0x3] (!%p323_p9)  ;;  %v1429_v13 = vmov (!%p323_p9), 12   ;;  %v1430_v14 = vmov (!%p323_p9), 5   ;;  %v1431_v15 = vmov (!%p323_p9), 15   ;;  %v1432_v16 = vmov (!%p323_p9), 7  }
  0x14   : > { %v463_v7 = vld [vmem:[%s1884_s3] sm:$0x3] (!%p323_p9)  ;;  %v728_v17 = vld [vmem:[%s1886_s5 + $0x8] sm:$0xff] (!%p323_p9)  ;;  %v1433_v18 = vmov (!%p323_p9), 8   ;;  %v1434_v20 = vmov (!%p323_p9), 10   ;;  %v1435_v22 = vmov (!%p323_p9), 11  }
  0x15   : > { %v727_v19 = vld [vmem:[%s1886_s5] sm:$0xff] (!%p323_p9)  ;;  %v1436_v23 = vmov (!%p323_p9), 13   ;;  %v1437_v24 = vmov (!%p323_p9), 14   ;;  %v730_v27 = vld [vmem:[%s1887_s6 + $0x8] sm:$0xff] (!%p323_p9)  ;;  %s1214_s27 = sshll.u32 (!%p323_p9), %s1516_s17, 1  ;;  %v1603_v29 = vshrl.u32 (!%p323_p9), %v389_v28, 7 }
  0x16   : > { %v1575_v21 = vld [vmem:[%s1888_s7] sm:$0x3] (!%p323_p9)  ;;  %p366_p10 = scmp.lt.s32.totalorder (!%p323_p9), %s1214_s27, 7  ;;  %s1897_s0 = sld [smem:[#allocation8_spill]] (!%p323_p9) }
  0x17   : > { %418 = vperm.xlu1 (!%p323_p9), %1288, %v377_v4   ;;  %1290 = vset.pattern.permute.xlu0 (!%p323_p9), %v1423_v3  ;;  %v729_v25 = vld [vmem:[%s1887_s6] sm:$0xff] (!%p323_p9)  ;;  %v1610_v30 = vsub.s32 (!%p323_p9), 1, %v1603_v29  ;;  %v1613_v31 = vsub.s32 (!%p323_p9), 3, %v1603_v29  ;;  %v1616_v32 = vsub.s32 (!%p323_p9), 0, %v1603_v29  ;;  %v1619_v33 = vsub.s32 (!%p323_p9), 2, %v1603_v29  ;;  %s1710_s12 = sand.u32 (!%p323_p9), 1, %s1412_s14  }
  0x18   : > { %380 = vperm.xlu0 (!%p323_p9), %1290, %v374_v1   ;;  %v796_v26 = vld [vmem:[%s1889_s8] sm:$0x3] (!%p323_p9)  ;;  %s1893_s18 = sshll.u32 (!%p323_p9), %s1710_s12, 2  ;;  %s1892_s20 = sshll.u32 (!%p323_p9), %s1516_s17, 6 }
  0x19   : > { %s1905_s27 = smov (!%p366_p10, %s1214_s27), 7  ;;  %s364_s21 = scalar_lea.vmem [#allocation4], %s1893_s18 }
  0x1a   : > { %s1215_s28 = sshll.u32 %s1905_s27, 1  ;;  %s1117_s25 = sshll.u32 %s364_s21, 4  ;;  %s1739_s25 = int_to_ptr.vmem [resolvable:$true] %s1117_s25 }
  0x1b   : > { %1291 = vset.pattern.permute.xlu1 %v1422_v2  ;;  %s1089_s29 = scalar_lea.sflag [#allocation5], %s1710_s12  ;;  %s1326_s30 = scalar_lea.vmem %s1739_s25, 64 }
  0x1c   : > { %430 = vperm.xlu1 %1291, %v375_v5   ;;  %385 = vperm.xlu0 %1290, %v375_v5   ;;  %s369_s11 = scalar_lea.vmem %s1897_s0, %s1215_s28  ;;  %s1737_s28 = scalar_lea.hbm %s1891_s10, %s1892_s20 }
  0x1d   : > { %v373_v34 = vld [vmem:[%s369_s11] sm:$0xf]  ;;  %p1327_p11 = scmp.ne.s32.totalorder %s1739_s25, %s1326_s30  ;;  %s1438_s11 = smov [#allocation4]  }
  0x1e   : > { %v436_v35 = vrot.slane %v373_v34, %v1610_v30  ;;  %v440_v36 = vrot.slane %v373_v34, %v1613_v31  ;;  %v392_v37 = vrot.slane %v373_v34, %v1616_v32  ;;  %v396_v38 = vrot.slane %v373_v34, %v1619_v33  ;;  %s1330_s26 = sshll.u32 %s1438_s11, 4  ;;  %s1331_s26 = int_to_ptr.vmem [resolvable:$false] %s1330_s26 }
  0x1f   : > { %p1328_p12 = pnand %p1327_p11, %p1533_p5  ;;  %s1332_s27 = scalar_lea.vmem %s1331_s26, 128 }
  0x20   : > { %1292 = vset.pattern.permute.xlu1 %v1423_v3  ;;  %482 = vperm.xlu0 %1290, %v464_v6   ;;  %v446_v41 = vrot.slane %v436_v35, %v1610_v30  ;;  %v450_v42 = vrot.slane %v440_v36, %v1610_v30  ;;  %v402_v43 = vrot.slane %v392_v37, %v1616_v32  ;;  %p1333_p0 = scmp.lt.s32.totalorder %s1739_s25, %s1331_s26  ;;  %p1334_p1 = scmp.lt.s32.totalorder %s1332_s27, %s1326_s30 }
  0x21   : > { %467 = vperm.xlu1 %1292, %v463_v7   ;;  %v406_v44 = vrot.slane %v396_v38, %v1616_v32  ;;  %p1329_p13 = pneg %p1328_p12 }
  0x22   : > { %p1335_p2 = por %p1334_p1, %p1333_p0 }
  0x24   : > { %1295 = vset.pattern.permute.xlu0 %v1424_v8  ;;  %p1336_p3 = pnand %p1335_p2, %p1329_p13 }
  0x25   : > { %1293 = vset.pattern.permute.xlu1 %v1422_v2  ;;  %520 = vperm.xlu0 %1295, %v463_v7  }
  0x26   : > { %488 = vperm.xlu1 %1293, %v463_v7  }
  0x29   : > { %1298 = vset.pattern.permute.xlu0 %v1425_v9 }
  0x2a   : > { %1294 = vset.pattern.permute.xlu1 %v1426_v10  ;;  %568 = vperm.xlu0 %1298, %v463_v7  }
  0x2b   : > { %504 = vperm.xlu1 %1294, %v463_v7  }
  0x2e   : > { %1301 = vset.pattern.permute.xlu0 %v1427_v11 }
  0x2f   : > { %1296 = vset.pattern.permute.xlu1 %v1428_v12  ;;  %616 = vperm.xlu0 %1301, %v463_v7  }
  0x30   : > { %536 = vperm.xlu1 %1296, %v463_v7  }
  0x33   : > { %1304 = vset.pattern.permute.xlu0 %v1429_v13 }
  0x34   : > { %1297 = vset.pattern.permute.xlu1 %v1430_v14  ;;  %664 = vperm.xlu0 %1304, %v463_v7  }
  0x35   : > { %552 = vperm.xlu1 %1297, %v463_v7  }
  0x38   : > { %1307 = vset.pattern.permute.xlu0 %v1431_v15 }
  0x39   : > { %1299 = vset.pattern.permute.xlu1 %v1432_v16  ;;  %712 = vperm.xlu0 %1307, %v463_v7  }
  0x3a   : > { %584 = vperm.xlu1 %1299, %v463_v7  }
  0x3d   : > { %1310 = vset.pattern.permute.xlu0 %v1423_v3 }
  0x3e   : > { %1300 = vset.pattern.permute.xlu1 %v1433_v18  ;;  %738 = vperm.xlu0 %1310, %v728_v17  }
  0x3f   : > { %600 = vperm.xlu1 %1300, %v463_v7  }
  0x42   : > { %1311 = vset.pattern.permute.xlu0 %v1422_v2 }
  0x43   : > { %1302 = vset.pattern.permute.xlu1 %v1434_v20  ;;  %768 = vperm.xlu0 %1311, %v727_v19  }
  0x44   : > { %632 = vperm.xlu1 %1302, %v463_v7  }
  0x47   : > { %820 = vperm.xlu0 %1311, %v1575_v21  }
  0x48   : > { %1303 = vset.pattern.permute.xlu1 %v1435_v22 }
  0x49   : > { %648 = vperm.xlu1 %1303, %v463_v7  }
  0x4b   : > { %772 = vperm.xlu0 %1311, %v728_v17  }
  0x4d   : > { %1305 = vset.pattern.permute.xlu1 %v1436_v23 }
  0x4e   : > { %680 = vperm.xlu1 %1305, %v463_v7  }
  0x4f   : > { %1316 = vset.pattern.permute.xlu0 %v1425_v9 }
  0x50   : > { %900 = vperm.xlu0 %1316, %v1575_v21  }
  0x52   : > { %1306 = vset.pattern.permute.xlu1 %v1437_v24 }
  0x53   : > { %696 = vperm.xlu1 %1306, %v463_v7  }
  0x54   : > { %1319 = vset.pattern.permute.xlu0 %v1427_v11  ;;  %v1650_v11 = vsub.s32 4, %v1603_v29 }
  0x55   : > { %948 = vperm.xlu0 %1319, %v1575_v21  }
  0x57   : > { %1308 = vset.pattern.permute.xlu1 %v1423_v3 }
  0x58   : > { %733 = vperm.xlu1 %1308, %v727_v19  }
  0x59   : > { %1322 = vset.pattern.permute.xlu0 %v1429_v13 }
  0x5a   : > { %996 = vperm.xlu0 %1322, %v1575_v21  }
  0x5c   : > { %755 = vperm.xlu1 %1308, %v729_v25  }
  0x5e   : > { %1325 = vset.pattern.permute.xlu0 %v1431_v15 }
  0x5f   : > { %1044 = vperm.xlu0 %1325, %v1575_v21  }
  0x60   : > { %799 = vperm.xlu1 %1308, %v1575_v21  }
  0x64   : > { %814 = vperm.xlu1 %1308, %v796_v26  }
  0x68   : > { %1309 = vset.pattern.permute.xlu1 %v1426_v10 }
  0x69   : > { %836 = vperm.xlu1 %1309, %v1575_v21  }
  0x6d   : > { %1312 = vset.pattern.permute.xlu1 %v1424_v8 }
  0x6e   : > { %852 = vperm.xlu1 %1312, %v1575_v21  }
  0x72   : > { %1313 = vset.pattern.permute.xlu1 %v1423_v3 }
  0x73   : > { %760 = vperm.xlu1 %1313, %v730_v27  }
  0x77   : > { %1314 = vset.pattern.permute.xlu1 %v1428_v12 }
  0x78   : > { %868 = vperm.xlu1 %1314, %v1575_v21  }
  0x7c   : > { %1315 = vset.pattern.permute.xlu1 %v1430_v14 }
  0x7d   : > { %884 = vperm.xlu1 %1315, %v1575_v21  }
  0x81   : > { %1317 = vset.pattern.permute.xlu1 %v1432_v16 }
  0x82   : > { %916 = vperm.xlu1 %1317, %v1575_v21  }
  0x86   : > { %1318 = vset.pattern.permute.xlu1 %v1433_v18 }
  0x87   : > { %932 = vperm.xlu1 %1318, %v1575_v21  }
  0x8b   : > { %1320 = vset.pattern.permute.xlu1 %v1434_v20 }
  0x8c   : > { %964 = vperm.xlu1 %1320, %v1575_v21  }
  0x90   : > { %1321 = vset.pattern.permute.xlu1 %v1435_v22 }
  0x91   : > { %980 = vperm.xlu1 %1321, %v1575_v21  }
  0x92   : > { %v414_v39 = vpop.permute.xlu1 %413  ;;  %v427_v40 = vpop.permute.xlu0 %426 }
  0x93   : > { %v451_v47 = vmul.f32 %v446_v41, %v427_v40  ;;  %v452_v48 = vmul.f32 %v450_v42, %v427_v40 }
  0x95   : > { %1323 = vset.pattern.permute.xlu1 %v1436_v23  ;;  %v1657_v23 = vsub.s32 5, %v1603_v29 }
  0x96   : > { %v419_v45 = vpop.permute.xlu1 %418  ;;  %1012 = vperm.xlu1 %1323, %v1575_v21  }
  0x97   : > { %v381_v46 = vpop.permute.xlu0 %380 }
  0x98   : > { %v407_v49 = vmul.f32 %v402_v43, %v381_v46  ;;  %v408_v50 = vmul.f32 %v406_v44, %v381_v46 }
  0x9a   : > { %v421_v51 = vadd.f32 %v414_v39, %v407_v49  ;;  %v422_v52 = vadd.f32 %v414_v39, %v408_v50  ;;  %1324 = vset.pattern.permute.xlu1 %v1437_v24 }
  0x9b   : > { %1028 = vperm.xlu1 %1324, %v1575_v21   ;;  %v431_v53 = vpop.permute.xlu1 %430  ;;  %v386_v58 = vpop.permute.xlu0 %385 }
  0x9c   : > { %v455_v54 = vadd.f32 %v451_v47, %v421_v51  ;;  %v456_v55 = vadd.f32 %v452_v48, %v422_v52  ;;  %v409_v16 = vmul.f32 %v402_v43, %v386_v58  ;;  %v410_v17 = vmul.f32 %v406_v44, %v386_v58 }
  0x9d   : > { %v453_v40 = vmul.f32 %v446_v41, %v431_v53  ;;  %v454_v43 = vmul.f32 %v450_v42, %v431_v53  ;;  %v1664_v44 = vsub.s32 6, %v1603_v29 }
  0x9e   : > { %v1633_v56 = vmax.f32 %v455_v54, 0.0  ;;  %v1635_v57 = vmax.f32 %v456_v55, 0.0  ;;  %v423_v34 = vadd.f32 %v419_v45, %v409_v16  ;;  %v424_v35 = vadd.f32 %v419_v45, %v410_v17 }
  0x9f   : > { %v483_v3 = vpop.permute.xlu0 %482  ;;  %v1671_v45 = vsub.s32 7, %v1603_v29 }
  0xa0   : > { %v468_v59 = vpop.permute.xlu1 %467  ;;  %v473_v60 = vrot.slane %v1633_v56, %v1616_v32  ;;  %v477_v61 = vrot.slane %v1635_v57, %v1616_v32  ;;  %v494_v1 = vrot.slane %v1633_v56, %v1610_v30  ;;  %v498_v2 = vrot.slane %v1635_v57, %v1610_v30 }
  0xa1   : > { %v510_v8 = vrot.slane %v1633_v56, %v1619_v33  ;;  %v514_v9 = vrot.slane %v1635_v57, %v1619_v33  ;;  %v526_v19 = vrot.slane %v1633_v56, %v1613_v31  ;;  %v530_v20 = vrot.slane %v1635_v57, %v1613_v31 }
  0xa2   : > { %v478_v62 = vmul.f32 %v473_v60, %v468_v59  ;;  %v479_v63 = vmul.f32 %v477_v61, %v468_v59  ;;  %v542_v27 = vrot.slane %v1633_v56, %v1650_v11  ;;  %v546_v28 = vrot.slane %v1635_v57, %v1650_v11 }
  0xa3   : > { %v558_v46 = vrot.slane %v1633_v56, %v1657_v23  ;;  %v562_v47 = vrot.slane %v1635_v57, %v1657_v23  ;;  %v457_v48 = vadd.f32 %v453_v40, %v423_v34  ;;  %v458_v49 = vadd.f32 %v454_v43, %v424_v35 }
  0xa4   : > { %v485_v6 = vadd.f32 %v483_v3, %v478_v62  ;;  %v486_v7 = vadd.f32 %v483_v3, %v479_v63  ;;  %v521_v18 = vpop.permute.xlu0 %520  ;;  %v574_v53 = vrot.slane %v1633_v56, %v1664_v44  ;;  %v578_v55 = vrot.slane %v1635_v57, %v1664_v44 }
  0xa5   : > { %v489_v0 = vpop.permute.xlu1 %488  ;;  %v531_v24 = vmul.f32 %v526_v19, %v521_v18  ;;  %v532_v25 = vmul.f32 %v530_v20, %v521_v18  ;;  %v1677_v60 = vmax.f32 %v457_v48, 0.0  ;;  %v1679_v61 = vmax.f32 %v458_v49, 0.0 }
  0xa6   : > { %v499_v4 = vmul.f32 %v494_v1, %v489_v0  ;;  %v500_v5 = vmul.f32 %v498_v2, %v489_v0  ;;  %v590_v0 = vrot.slane %v1633_v56, %v1671_v45  ;;  %v594_v1 = vrot.slane %v1635_v57, %v1671_v45 }
  0xa7   : > { %v622_v56 = vrot.slane %v1677_v60, %v1610_v30  ;;  %v626_v57 = vrot.slane %v1679_v61, %v1610_v30  ;;  %v638_v20 = vrot.slane %v1677_v60, %v1619_v33  ;;  %v670_v40 = vrot.slane %v1677_v60, %v1650_v11 }
  0xa8   : > { %v501_v12 = vadd.f32 %v499_v4, %v485_v6  ;;  %v502_v13 = vadd.f32 %v500_v5, %v486_v7  ;;  %v606_v6 = vrot.slane %v1677_v60, %v1616_v32  ;;  %v610_v7 = vrot.slane %v1679_v61, %v1616_v32 }
  0xa9   : > { %v569_v42 = vpop.permute.xlu0 %568  ;;  %v674_v43 = vrot.slane %v1679_v61, %v1650_v11 }
  0xaa   : > { %v505_v10 = vpop.permute.xlu1 %504  ;;  %v579_v62 = vmul.f32 %v574_v53, %v569_v42  ;;  %v580_v29 = vmul.f32 %v578_v55, %v569_v42  ;;  %v702_v55 = vrot.slane %v1677_v60, %v1664_v44 }
  0xab   : > { %v515_v14 = vmul.f32 %v510_v8, %v505_v10  ;;  %v516_v15 = vmul.f32 %v514_v9, %v505_v10 }
  0xad   : > { %v517_v21 = vadd.f32 %v515_v14, %v501_v12  ;;  %v518_v22 = vadd.f32 %v516_v15, %v502_v13 }
  0xae   : > { %v617_v14 = vpop.permute.xlu0 %616 }
  0xaf   : > { %v537_v26 = vpop.permute.xlu1 %536  ;;  %v533_v36 = vadd.f32 %v531_v24, %v517_v21  ;;  %v534_v37 = vadd.f32 %v532_v25, %v518_v22  ;;  %v627_v17 = vmul.f32 %v622_v56, %v617_v14  ;;  %v628_v18 = vmul.f32 %v626_v57, %v617_v14 }
  0xb0   : > { %v547_v38 = vmul.f32 %v542_v27, %v537_v26  ;;  %v548_v39 = vmul.f32 %v546_v28, %v537_v26  ;;  %v642_v21 = vrot.slane %v1679_v61, %v1619_v33  ;;  %v654_v27 = vrot.slane %v1677_v60, %v1613_v31 }
  0xb1   : > { %v658_v28 = vrot.slane %v1679_v61, %v1613_v31 }
  0xb2   : > { %v549_v51 = vadd.f32 %v547_v38, %v533_v36  ;;  %v550_v52 = vadd.f32 %v548_v39, %v534_v37 }
  0xb3   : > { %v665_v39 = vpop.permute.xlu0 %664 }
  0xb4   : > { %v553_v50 = vpop.permute.xlu1 %552  ;;  %v675_v48 = vmul.f32 %v670_v40, %v665_v39  ;;  %v676_v49 = vmul.f32 %v674_v43, %v665_v39 }
  0xb5   : > { %v563_v54 = vmul.f32 %v558_v46, %v553_v50  ;;  %v564_v41 = vmul.f32 %v562_v47, %v553_v50 }
  0xb7   : > { %v565_v58 = vadd.f32 %v563_v54, %v549_v51  ;;  %v566_v59 = vadd.f32 %v564_v41, %v550_v52  ;;  %v686_v51 = vrot.slane %v1677_v60, %v1657_v23  ;;  %v690_v52 = vrot.slane %v1679_v61, %v1657_v23 }
  0xb9   : > { %v585_v63 = vpop.permute.xlu1 %584  ;;  %v581_v2 = vadd.f32 %v579_v62, %v565_v58  ;;  %v582_v3 = vadd.f32 %v580_v29, %v566_v59  ;;  %v706_v58 = vrot.slane %v1679_v61, %v1664_v44  ;;  %v713_v59 = vpop.permute.xlu0 %712  ;;  %v718_v62 = vrot.slane %v1677_v60, %v1671_v45 }
  0xba   : > { %v595_v4 = vmul.f32 %v590_v0, %v585_v63  ;;  %v596_v5 = vmul.f32 %v594_v1, %v585_v63  ;;  %v722_v29 = vrot.slane %v1679_v61, %v1671_v45 }
  0xbc   : > { %v597_v9 = vadd.f32 %v595_v4, %v581_v2  ;;  %v598_v10 = vadd.f32 %v596_v5, %v582_v3  ;;  %v723_v4 = vmul.f32 %v718_v62, %v713_v59  ;;  %v724_v5 = vmul.f32 %v722_v29, %v713_v59 }
  0xbd   : > { %v1724_v60 = vpop.permute.xlu0 %738 }
  0xbe   : > { %v601_v8 = vpop.permute.xlu1 %600 }
  0xbf   : > { %v611_v12 = vmul.f32 %v606_v6, %v601_v8  ;;  %v612_v13 = vmul.f32 %v610_v7, %v601_v8 }
  0xc1   : > { %v613_v15 = vadd.f32 %v611_v12, %v597_v9  ;;  %v614_v16 = vadd.f32 %v612_v13, %v598_v10 }
  0xc3   : > { %v633_v19 = vpop.permute.xlu1 %632  ;;  %v629_v22 = vadd.f32 %v627_v17, %v613_v15  ;;  %v630_v24 = vadd.f32 %v628_v18, %v614_v16 }
  0xc4   : > { %v643_v25 = vmul.f32 %v638_v20, %v633_v19  ;;  %v644_v26 = vmul.f32 %v642_v21, %v633_v19 }
  0xc6   : > { %v645_v35 = vadd.f32 %v643_v25, %v629_v22  ;;  %v646_v36 = vadd.f32 %v644_v26, %v630_v24 }
  0xc8   : > { %v649_v34 = vpop.permute.xlu1 %648 }
  0xc9   : > { %v659_v37 = vmul.f32 %v654_v27, %v649_v34  ;;  %v660_v38 = vmul.f32 %v658_v28, %v649_v34 }
  0xcb   : > { %v661_v46 = vadd.f32 %v659_v37, %v645_v35  ;;  %v662_v47 = vadd.f32 %v660_v38, %v646_v36 }
  0xcd   : > { %v681_v50 = vpop.permute.xlu1 %680  ;;  %v677_v54 = vadd.f32 %v675_v48, %v661_v46  ;;  %v678_v41 = vadd.f32 %v676_v49, %v662_v47 }
  0xce   : > { %v691_v42 = vmul.f32 %v686_v51, %v681_v50  ;;  %v692_v53 = vmul.f32 %v690_v52, %v681_v50 }
  0xd0   : > { %v693_v0 = vadd.f32 %v691_v42, %v677_v54  ;;  %v694_v1 = vadd.f32 %v692_v53, %v678_v41 }
  0xd2   : > { %v697_v63 = vpop.permute.xlu1 %696 }
  0xd3   : > { %v707_v2 = vmul.f32 %v702_v55, %v697_v63  ;;  %v708_v3 = vmul.f32 %v706_v58, %v697_v63 }
  0xd5   : > { %v709_v6 = vadd.f32 %v707_v2, %v693_v0  ;;  %v710_v7 = vadd.f32 %v708_v3, %v694_v1 }
  0xd7   : > { %v725_v8 = vadd.f32 %v723_v4, %v709_v6  ;;  %v726_v9 = vadd.f32 %v724_v5, %v710_v7  ;;  %v734_v10 = vpop.permute.xlu1 %733 }
  0xd9   : > { %v1727_v61 = vrot.slane %v725_v8, %v1616_v32  ;;  %v1730_v12 = vrot.slane %v726_v9, %v1616_v32  ;;  %v1061_v13 = vcombine.low %v725_v8, %v726_v9  ;;  %v1742_v14 = vrot.slane %v725_v8, %v1610_v30 }
  0xda   : > { %v1745_v56 = vrot.slane %v726_v9, %v1610_v30 }
  0xdb   : > { %v749_v57 = vmul.f32 %v1727_v61, %v734_v10  ;;  %v750_v15 = vmul.f32 %v1730_v12, %v734_v10  ;;  %v756_v16 = vpop.permute.xlu1 %755  ;;  %1216 = vst.sshfl [vmem:[%s364_s21] sm:$0x33 pattern:$0x76325410] %v1061_v13 }
  0xdd   : > { %v763_v17 = vadd.f32 %v756_v16, %v749_v57  ;;  %v764_v18 = vadd.f32 %v756_v16, %v750_v15 }
  0xde   : > { %1339 = shalt.err (!%p1336_p3)
}
  0xdf   : > { %s1340_s21 = scalar_lea.hbm %s1737_s28, 64  ;;  %s1344_s11 = scalar_lea.hbm %s1891_s10, 256 }
  0xe0   : > { %p1341_p4 = scmp.ne.s32.totalorder %s1737_s28, %s1340_s21  ;;  %p1345_p9 = scmp.lt.u32.totalorder %s1737_s28, %s1891_s10 }
  0xe1   : > { %p1346_p10 = scmp.lt.u32.totalorder %s1344_s11, %s1340_s21  ;;  %p1348_p12 = scmp.lt.u32.totalorder %s1340_s21, %s1737_s28 }
  0xe2   : > { %p1342_p7 = pnand %p1341_p4, %p1533_p5 }
  0xe3   : > { %p1347_p11 = por %p1346_p10, %p1345_p9 }
  0xe4   : > { %p1343_p8 = pneg %p1342_p7 }
  0xe5   : > { %p1349_p13 = por %p1348_p12, %p1347_p11 }
  0xe7   : > { %p1350_p0 = pnand %p1349_p13, %p1343_p8 }
  0xe9   : > { %1353 = shalt.err (!%p1350_p0)
}
  0xea   : > { %1229 = dma.vmem_to_hbm [thread:$0]  (%p1533_p5), %s1739_s25, 64, %s1737_s28, %s1089_s29   ;;  %v769_v19 = vpop.permute.xlu0 %768  ;;  %v800_v22 = vpop.permute.xlu1 %799  ;;  %v751_v62 = vmul.f32 %v1727_v61, %v1724_v60  ;;  %v752_v29 = vmul.f32 %v1730_v12, %v1724_v60 }
  0xeb   : > { %v783_v20 = vmul.f32 %v1742_v14, %v769_v19  ;;  %v784_v21 = vmul.f32 %v1745_v56, %v769_v19  ;;  %s1898_s0 = sshll.u32 %s1710_s12, 2  ;;  %s1899_s25 = sshll.u32 %s1516_s17, 6 }
  0xec   : > { %s357_s18 = scalar_lea.vmem [#allocation2], %s1898_s0  ;;  %s1838_s30 = scalar_lea.hbm %s1890_s9, %s1899_s25 }
  0xed   : > { %v787_v24 = vadd.f32 %v783_v20, %v763_v17  ;;  %v788_v25 = vadd.f32 %v784_v21, %v764_v18  ;;  %s1103_s20 = sshll.u32 %s357_s18, 4  ;;  %s1084_s27 = scalar_lea.sflag [#allocation3], %s1710_s12  ;;  %s1840_s20 = int_to_ptr.vmem [resolvable:$true] %s1103_s20 }
  0xee   : > { %v815_v26 = vpop.permute.xlu1 %814  ;;  %v821_v46 = vpop.permute.xlu0 %820  ;;  %s1354_s21 = scalar_lea.vmem %s1840_s20, 64  ;;  %s1439_s11 = smov [#allocation2]  }
  0xef   : > { %v1773_v27 = vmax.f32 %v787_v24, 0.0  ;;  %v1775_v28 = vmax.f32 %v788_v25, 0.0  ;;  %p1355_p1 = scmp.ne.s32.totalorder %s1840_s20, %s1354_s21  ;;  %s1358_s26 = sshll.u32 %s1439_s11, 4  ;;  %s1359_s26 = int_to_ptr.vmem [resolvable:$false] %s1358_s26 }
  0xf0   : > { %s1360_s17 = scalar_lea.vmem %s1359_s26, 128  ;;  %p1361_p4 = scmp.lt.s32.totalorder %s1840_s20, %s1359_s26 }
  0xf1   : > { %v805_v35 = vrot.slane %v1773_v27, %v1616_v32  ;;  %v809_v36 = vrot.slane %v1775_v28, %v1616_v32  ;;  %v826_v40 = vrot.slane %v1773_v27, %v1610_v30  ;;  %v830_v43 = vrot.slane %v1775_v28, %v1610_v30  ;;  %p1356_p2 = pnand %p1355_p1, %p1533_p5  ;;  %p1362_p7 = scmp.lt.s32.totalorder %s1360_s17, %s1354_s21 }
  0xf2   : > { %v837_v34 = vpop.permute.xlu1 %836  ;;  %v842_v52 = vrot.slane %v1773_v27, %v1619_v33  ;;  %v846_v54 = vrot.slane %v1775_v28, %v1619_v33  ;;  %v858_v41 = vrot.slane %v1773_v27, %v1613_v31  ;;  %v862_v42 = vrot.slane %v1775_v28, %v1613_v31  ;;  %v773_v63 = vpop.permute.xlu0 %772 }
  0xf3   : > { %v810_v37 = vmul.f32 %v805_v35, %v800_v22  ;;  %v811_v38 = vmul.f32 %v809_v36, %v800_v22  ;;  %v831_v50 = vmul.f32 %v826_v40, %v821_v46  ;;  %v832_v51 = vmul.f32 %v830_v43, %v821_v46  ;;  %p1357_p3 = pneg %p1356_p2  ;;  %p1363_p8 = por %p1362_p7, %p1361_p4 }
  0xf4   : > { %v847_v58 = vmul.f32 %v842_v52, %v837_v34  ;;  %v848_v59 = vmul.f32 %v846_v54, %v837_v34  ;;  %v874_v3 = vrot.slane %v1773_v27, %v1650_v11  ;;  %v878_v4 = vrot.slane %v1775_v28, %v1650_v11 }
  0xf5   : > { %v817_v47 = vadd.f32 %v815_v26, %v810_v37  ;;  %v818_v48 = vadd.f32 %v815_v26, %v811_v38  ;;  %v785_v61 = vmul.f32 %v1742_v14, %v773_v63  ;;  %v786_v60 = vmul.f32 %v1745_v56, %v773_v63  ;;  %p1364_p9 = pnand %p1363_p8, %p1357_p3 }
  0xf6   : > { %v853_v39 = vpop.permute.xlu1 %852  ;;  %v890_v57 = vrot.slane %v1773_v27, %v1657_v23  ;;  %v894_v15 = vrot.slane %v1775_v28, %v1657_v23  ;;  %v906_v16 = vrot.slane %v1773_v27, %v1664_v44  ;;  %v910_v17 = vrot.slane %v1775_v28, %v1664_v44  ;;  %v901_v14 = vpop.permute.xlu0 %900 }
  0xf7   : > { %v833_v53 = vadd.f32 %v831_v50, %v817_v47  ;;  %v834_v55 = vadd.f32 %v832_v51, %v818_v48  ;;  %v863_v0 = vmul.f32 %v858_v41, %v853_v39  ;;  %v864_v1 = vmul.f32 %v862_v42, %v853_v39 }
  0xf8   : > { %v911_v34 = vmul.f32 %v906_v16, %v901_v14  ;;  %v912_v35 = vmul.f32 %v910_v17, %v901_v14  ;;  %v922_v39 = vrot.slane %v1773_v27, %v1671_v45  ;;  %v926_v40 = vrot.slane %v1775_v28, %v1671_v45 }
  0xf9   : > { %v849_v7 = vadd.f32 %v847_v58, %v833_v53  ;;  %v850_v8 = vadd.f32 %v848_v59, %v834_v55 }
  0xfa   : > { %v761_v49 = vpop.permute.xlu1 %760  ;;  %v949_v28 = vpop.permute.xlu0 %948 }
  0xfb   : > { %v765_v5 = vadd.f32 %v761_v49, %v751_v62  ;;  %v766_v6 = vadd.f32 %v761_v49, %v752_v29  ;;  %v865_v12 = vadd.f32 %v863_v0, %v849_v7  ;;  %v866_v13 = vadd.f32 %v864_v1, %v850_v8 }
  0xfd   : > { %v789_v18 = vadd.f32 %v785_v61, %v765_v5  ;;  %v790_v19 = vadd.f32 %v786_v60, %v766_v6 }
  0xfe   : > { %v869_v2 = vpop.permute.xlu1 %868 }
  0xff   : > { %v879_v9 = vmul.f32 %v874_v3, %v869_v2  ;;  %v880_v10 = vmul.f32 %v878_v4, %v869_v2  ;;  %v793_v36 = vmax.f32 %v789_v18, 0.0  ;;  %v794_v37 = vmax.f32 %v790_v19, 0.0 }
 0x101   : > { %v881_v21 = vadd.f32 %v879_v9, %v865_v12  ;;  %v882_v56 = vadd.f32 %v880_v10, %v866_v13  ;;  %v938_v49 = vrot.slane %v793_v36, %v1616_v32  ;;  %v942_v50 = vrot.slane %v794_v37, %v1616_v32 }
 0x102   : > { %v885_v20 = vpop.permute.xlu1 %884  ;;  %v954_v51 = vrot.slane %v793_v36, %v1610_v30  ;;  %v958_v52 = vrot.slane %v794_v37, %v1610_v30  ;;  %v970_v63 = vrot.slane %v793_v36, %v1619_v33  ;;  %v974_v0 = vrot.slane %v794_v37, %v1619_v33  ;;  %v997_v33 = vpop.permute.xlu0 %996 }
 0x103   : > { %v895_v22 = vmul.f32 %v890_v57, %v885_v20  ;;  %v896_v24 = vmul.f32 %v894_v15, %v885_v20  ;;  %v986_v30 = vrot.slane %v793_v36, %v1613_v31  ;;  %v990_v4 = vrot.slane %v794_v37, %v1613_v31 }
 0x104   : > { %v959_v59 = vmul.f32 %v954_v51, %v949_v28  ;;  %v960_v62 = vmul.f32 %v958_v52, %v949_v28  ;;  %v1002_v5 = vrot.slane %v793_v36, %v1650_v11  ;;  %v1006_v6 = vrot.slane %v794_v37, %v1650_v11 }
 0x105   : > { %v897_v25 = vadd.f32 %v895_v22, %v881_v21  ;;  %v898_v26 = vadd.f32 %v896_v24, %v882_v56  ;;  %v1018_v16 = vrot.slane %v793_v36, %v1657_v23  ;;  %v1022_v17 = vrot.slane %v794_v37, %v1657_v23 }
 0x106   : > { %v917_v38 = vpop.permute.xlu1 %916  ;;  %v1007_v13 = vmul.f32 %v1002_v5, %v997_v33  ;;  %v1008_v57 = vmul.f32 %v1006_v6, %v997_v33  ;;  %v1050_v20 = vrot.slane %v793_v36, %v1671_v45  ;;  %v1054_v14 = vrot.slane %v794_v37, %v1671_v45  ;;  %v1045_v22 = vpop.permute.xlu0 %1044 }
 0x107   : > { %v913_v43 = vadd.f32 %v911_v34, %v897_v25  ;;  %v914_v46 = vadd.f32 %v912_v35, %v898_v26  ;;  %v927_v47 = vmul.f32 %v922_v39, %v917_v38  ;;  %v928_v48 = vmul.f32 %v926_v40, %v917_v38 }
 0x108   : > { %v1034_v21 = vrot.slane %v793_v36, %v1664_v44  ;;  %v1038_v56 = vrot.slane %v794_v37, %v1664_v44  ;;  %v1055_v35 = vmul.f32 %v1050_v20, %v1045_v22  ;;  %v1056_v38 = vmul.f32 %v1054_v14, %v1045_v22 }
 0x109   : > { %v929_v41 = vadd.f32 %v927_v47, %v913_v43  ;;  %v930_v42 = vadd.f32 %v928_v48, %v914_v46 }
 0x10a   : > { %v933_v54 = vpop.permute.xlu1 %932 }
 0x10b   : > { %v943_v53 = vmul.f32 %v938_v49, %v933_v54  ;;  %v944_v27 = vmul.f32 %v942_v50, %v933_v54 }
 0x10d   : > { %v945_v55 = vadd.f32 %v943_v53, %v929_v41  ;;  %v946_v58 = vadd.f32 %v944_v27, %v930_v42 }
 0x10e   : > { %v965_v29 = vpop.permute.xlu1 %964 }
 0x10f   : > { %v961_v32 = vadd.f32 %v959_v59, %v945_v55  ;;  %v962_v1 = vadd.f32 %v960_v62, %v946_v58  ;;  %v975_v2 = vmul.f32 %v970_v63, %v965_v29  ;;  %v976_v3 = vmul.f32 %v974_v0, %v965_v29 }
 0x111   : > { %v977_v8 = vadd.f32 %v975_v2, %v961_v32  ;;  %v978_v9 = vadd.f32 %v976_v3, %v962_v1 }
 0x112   : > { %v981_v7 = vpop.permute.xlu1 %980 }
 0x113   : > { %v991_v10 = vmul.f32 %v986_v30, %v981_v7  ;;  %v992_v61 = vmul.f32 %v990_v4, %v981_v7 }
 0x115   : > { %v993_v60 = vadd.f32 %v991_v10, %v977_v8  ;;  %v994_v12 = vadd.f32 %v992_v61, %v978_v9 }
 0x116   : > { %v1013_v15 = vpop.permute.xlu1 %1012 }
 0x117   : > { %v1009_v31 = vadd.f32 %v1007_v13, %v993_v60  ;;  %v1010_v18 = vadd.f32 %v1008_v57, %v994_v12  ;;  %v1023_v19 = vmul.f32 %v1018_v16, %v1013_v15  ;;  %v1024_v11 = vmul.f32 %v1022_v17, %v1013_v15 }
 0x119   : > { %v1025_v25 = vadd.f32 %v1023_v19, %v1009_v31  ;;  %v1026_v26 = vadd.f32 %v1024_v11, %v1010_v18 }
 0x11a   : > { %v1029_v24 = vpop.permute.xlu1 %1028 }
 0x11b   : > { %v1039_v23 = vmul.f32 %v1034_v21, %v1029_v24  ;;  %v1040_v34 = vmul.f32 %v1038_v56, %v1029_v24 }
 0x11d   : > { %v1041_v39 = vadd.f32 %v1039_v23, %v1025_v25  ;;  %v1042_v40 = vadd.f32 %v1040_v34, %v1026_v26 }
 0x11f   : > { %v1057_v45 = vadd.f32 %v1055_v35, %v1041_v39  ;;  %v1058_v36 = vadd.f32 %v1056_v38, %v1042_v40 }
 0x121   : > { %v1073_v43 = vcombine.low %v1057_v45, %v1058_v36 }
 0x123   : > { %1217 = vst.sshfl [vmem:[%s357_s18] sm:$0x33 pattern:$0x76325410] %v1073_v43 }
 0x124   : > { %1367 = shalt.err (!%p1364_p9)
}
 0x125   : > { %s1368_s12 = scalar_lea.hbm %s1838_s30, 64  ;;  %s1372_s25 = scalar_lea.hbm %s1890_s9, 256 }
 0x126   : > { %p1369_p10 = scmp.ne.s32.totalorder %s1838_s30, %s1368_s12  ;;  %p1373_p13 = scmp.lt.u32.totalorder %s1838_s30, %s1890_s9 }
 0x127   : > { %p1374_p0 = scmp.lt.u32.totalorder %s1372_s25, %s1368_s12  ;;  %p1376_p2 = scmp.lt.u32.totalorder %s1368_s12, %s1838_s30 }
 0x128   : > { %p1370_p11 = pnand %p1369_p10, %p1533_p5 }
 0x129   : > { %p1375_p1 = por %p1374_p0, %p1373_p13 }
 0x12a   : > { %p1371_p12 = pneg %p1370_p11 }
 0x12b   : > { %p1377_p3 = por %p1376_p2, %p1375_p1 }
 0x12d   : > { %p1378_p4 = pnand %p1377_p3, %p1371_p12 }
 0x12f   : > { %1381 = shalt.err (!%p1378_p4)
}
 0x130   : > { %1228 = dma.vmem_to_hbm [thread:$0]  (%p1533_p5), %s1840_s20, 64, %s1838_s30, %s1084_s27  }
 0x131 PF: > { %p1239_p7 = scmp.ge.s32.totalorder %s1420_s16, 2  ;;  %s1129_s21 = sand.u32 1, %s1408_s13  }
 0x132   : > { %s1130_s11 = scalar_lea.sflag [#allocation3], %s1129_s21 }
 0x133   : > { %p1233_p8 = pnand %p1239_p7, %p1537_p6 }
 0x135   : > { %1399 = dma.done.wait (!%p1233_p8), %s1130_s11, 64  }
 0x136   : > { %1401 = vsyncadd (!%p1233_p8), %s1130_s11, 4294967232  ;;  %s1139_s26 = scalar_lea.sflag [#allocation5], %s1129_s21 }
 0x137   : > { %1403 = dma.done.wait (!%p1233_p8), %s1139_s26, 64  }
 0x138   : > { %1405 = vsyncadd (!%p1233_p8), %s1139_s26, 4294967232  ;;  %p24_p5 = scmp.ge.s32.totalorder %s1520_s19, 6   ;;  %s1900_s13 = smov %s1412_s14 }
 0x139   : > { %s1901_s14 = smov %s1416_s15  ;;  %s1902_s15 = smov %s1531_s22 }
 0x13a   : > { %s1903_s16 = smov %s1520_s19  ;;  %26 = sbr.rel (!%p24_p5) target bundleno = 7 (0x7), region = 108 }
 0x141   :  { %1144 = vsyncpa [#allocation3], 1 }
 0x142   :  { %1146 = vsyncpa [#allocation3 + $0x1], 1 }
 0x143   :  { %1147 = vsyncpa [#allocation5], 1 }
 0x144   :  { %1149 = vsyncpa [#allocation5 + $0x1], 1 }

</bundles_post_ra>
